<compile_context>
chip_gen: v7x
topology: tpu7x:2x2x1
jax: 0.10.0
libtpu: 0.0.40
codegen_flags: <defaults>
</compile_context>

<pallas_src>
import math

import jax
import jax.numpy as jnp
from jax.experimental import pallas as pl
from jax.experimental.pallas import tpu as pltpu

_LANE = 128
_SUBLANE = 8


def _round_up(x, m):
    return ((x + m - 1) // m) * m


def _detect_tpu_generation():
    try:
        kind = jax.devices()[0].device_kind.lower()
    except Exception:
        return "unknown"
    if "v5" in kind:
        return "v5"
    if "v6" in kind:
        return "v6"
    if "v7" in kind or "7x" in kind:
        return "v7"
    return "unknown"


def _meta_update_kernel(w_ref, g_ref, f_ref, b_ref, out_ref):
    # w_ref : SMEM (2,) meta-learner weights -> [w_grad, w_data]
    # g_ref / f_ref / b_ref / out_ref : VMEM (tile_rows, 128) tiles
    w_grad = w_ref[0]  # multiplies stack index 0 (the gradient)
    w_data = w_ref[1]  # multiplies stack index 1 (the parameter value)
    out_ref[...] = b_ref[...] + w_grad * g_ref[...] + w_data * f_ref[...]


class MetaLearnerPallas:
    """JAX/Pallas port of MetaLearner.

    The PyTorch module holds a single Parameter of shape (1, 2) (uninitialized
    torch.Tensor -> initialized deterministically here, stored flat as (2,)).
    The "models" are represented functionally as dicts name -> array; the
    packed flat layout is precomputed once and, in the preferred path, the
    slabs stay resident in that layout across optimizer steps.
    """

    def __init__(self, param_shapes):
        self.weights = jnp.array([0.05, -0.01], dtype=jnp.float32)  # (2,)

        # --- static packed layout (computed once, reused every step) ---------
        self.names = sorted(param_shapes)
        self.shapes = {n: tuple(param_shapes[n]) for n in self.names}
        self.sizes = {n: int(math.prod(self.shapes[n])) for n in self.names}
        self.offsets, off = {}, 0
        for n in self.names:
            self.offsets[n] = off
            off += self.sizes[n]
        self.total = off

        # --- generation-aware tile sizing ------------------------------------
        gen = _detect_tpu_generation()
        if gen == "v7":
            tile_rows_max = 8192            # 32 MiB double-buffered footprint
            vmem_limit = 48 << 20           # > 32 MiB scoped default on v7x
        elif gen == "v6":
            tile_rows_max = 4096            # 16 MiB, fits 32 MiB scoped default
            vmem_limit = None
        else:                               # v5e / unknown: 16 MiB scoped default
            tile_rows_max = 2048            # 8 MiB double-buffered footprint
            vmem_limit = None

        # Padding-bounded tiling: at most (_SUBLANE - 1) padded rows per tile.
        rows_min = _round_up(pl.cdiv(self.total, _LANE), _SUBLANE)
        n_tiles = pl.cdiv(rows_min, tile_rows_max)
        self.tile_rows = _round_up(pl.cdiv(rows_min, n_tiles), _SUBLANE)
        self.rows = n_tiles * self.tile_rows
        self.n_tiles = n_tiles

        dims = ("parallel",)
        core_par = getattr(pltpu, "CORE_PARALLEL", None)
        if gen == "v7" and core_par is not None and n_tiles % 2 == 0:
            # Only core_parallel actually shards the grid across v7x's 2 TCs.
            dims = (core_par,)

        cp_kwargs = dict(dimension_semantics=dims)
        if vmem_limit is not None:
            cp_kwargs["vmem_limit_bytes"] = vmem_limit

        blk = lambda i: (i, 0)
        vspec = pl.BlockSpec((self.tile_rows, _LANE), blk)
        self._kernel = pl.pallas_call(
            _meta_update_kernel,
            out_shape=jax.ShapeDtypeStruct((self.rows, _LANE), jnp.float32),
            grid_spec=pltpu.PrefetchScalarGridSpec(
                num_scalar_prefetch=0,
                grid=(self.n_tiles,),
                in_specs=[
                    pl.BlockSpec(memory_space=pltpu.MemorySpace.SMEM),  # (2,) W
                    vspec,  # grad slab
                    vspec,  # forward-param slab
                    vspec,  # backward-param slab
                ],
                out_specs=vspec,
            ),
            # new_b overwrites b in place (index counts the SMEM weights operand).
            input_output_aliases={3: 0},
            compiler_params=pltpu.CompilerParams(**cp_kwargs),
        )

        # Preferred path: slabs stay resident; donate b so the alias survives jit.
        self._step_slabs = jax.jit(self._kernel, donate_argnums=(3,))
        # Spec-faithful dict path: pack -> kernel -> unpack fused under one jit.
        self._step_dicts = jax.jit(self._step_dicts_impl)

    # --- packed lane-dense layout helpers (static slices, fused under jit) ---
    def pack(self, tree):
        flat = jnp.concatenate(
            [jnp.ravel(tree[n]).astype(jnp.float32) for n in self.names])
        flat = jnp.pad(flat, (0, self.rows * _LANE - self.total))
        return flat.reshape(self.rows, _LANE)

    def unpack(self, slab):
        flat = slab.reshape(-1)
        return {
            n: flat[self.offsets[n]:self.offsets[n] + self.sizes[n]].reshape(
                self.shapes[n])
            for n in self.names
        }

    def _step_dicts_impl(self, weights, grads, f_params, b_params):
        g_slab = self.pack(grads)
        f_slab = self.pack(f_params)
        b_slab = self.pack(b_params)
        new_b_slab = self._kernel(weights, g_slab, f_slab, b_slab)
        return self.unpack(new_b_slab)

    # --- preferred training-loop API: slab-resident, no pack/unpack traffic --
    def step_packed(self, grad_slab, f_slab, b_slab):
        """One optimizer step on resident (rows, 128) slabs.

        b_slab is donated (overwritten in place).  Returns
        (new_forward_slab, new_backward_slab); they share the same values,
        mirroring `param_f.data = param_b.data`.
        """
        new_b_slab = self._step_slabs(self.weights, grad_slab, f_slab, b_slab)
        return new_b_slab, new_b_slab

    # --- spec-faithful dict API (mirrors MetaLearner.forward) ----------------
    def forward(self, forward_grads, forward_params, backward_params):
        new_backward = self._step_dicts(
            self.weights, forward_grads, forward_params, backward_params)
        # Mirrors `param_f.data = param_b.data` (forward model copies backward).
        new_forward = dict(new_backward)
        return new_forward, new_backward


if __name__ == "__main__":
    key = jax.random.PRNGKey(0)

    # A small synthetic "model" (conv + fc), NCHW-style conv weight layout.
    # TODO(synk): shared-parameter re-pointing done by get_params() has no
    # array-level equivalent; parameters are represented as an explicit dict.
    param_shapes = {
        "conv.weight": (4, 4, 3, 3),   # (out_ch, in_ch, kh, kw)
        "conv.bias": (4,),
        "fc.weight": (8, 32),
        "fc.bias": (8,),
    }

    forward_params, forward_grads = {}, {}
    for i, (name, shp) in enumerate(sorted(param_shapes.items())):
        k1, k2 = jax.random.split(jax.random.fold_in(key, i))
        forward_params[name] = jax.random.normal(k1, shp, dtype=jnp.float32)
        forward_grads[name] = jax.random.normal(k2, shp, dtype=jnp.float32)
    # backward_model is "identical to forward_model"
    backward_params = {k: v for k, v in forward_params.items()}

    meta = MetaLearnerPallas(param_shapes)

    # --- 1) spec-faithful dict path ------------------------------------------
    new_f, new_b = meta.forward(forward_grads, forward_params, backward_params)
    jax.block_until_ready(new_b)

    # Reference check (plain JAX) against the exact PyTorch semantics.
    w_grad = meta.weights[0]
    w_data = meta.weights[1]
    for name in param_shapes:
        expected = (backward_params[name]
                    + w_grad * forward_grads[name]
                    + w_data * forward_params[name])
        assert new_b[name].shape == tuple(param_shapes[name])
        assert new_b[name].dtype == jnp.float32
        assert jnp.allclose(new_b[name], expected, atol=1e-6, rtol=1e-6)
        assert jnp.allclose(new_f[name], new_b[name])

    # --- 2) slab-resident path (preferred in a real training loop) -----------
    g_slab = meta.pack(forward_grads)
    f_slab = meta.pack(forward_params)
    b_slab = meta.pack(backward_params)          # donated below (overwritten)
    new_f_slab, new_b_slab = meta.step_packed(g_slab, f_slab, b_slab)
    jax.block_until_ready(new_b_slab)
    new_b2 = meta.unpack(new_b_slab)
    for name in param_shapes:
        assert jnp.allclose(new_b2[name], new_b[name], atol=1e-6, rtol=1e-6)

    print("KERNEL_OK")
</pallas_src>

<mosaic_0001>
module attributes {stable_mosaic.version = 11 : i64} {
  func.func @_meta_update_kernel(%arg0: i32, %arg1: memref<2xf32, #tpu.memory_space<smem>>, %arg2: memref<8x128xf32, #tpu.memory_space<vmem>>, %arg3: memref<8x128xf32, #tpu.memory_space<vmem>>, %arg4: memref<8x128xf32, #tpu.memory_space<vmem>>, %arg5: memref<8x128xf32, #tpu.memory_space<vmem>>) attributes {dimension_semantics = [#tpu.dimension_semantics<parallel>], iteration_bounds = array<i64: 1>, scalar_prefetch = 0 : i64, scratch_operands = 0 : i64, tpu.core_type = #tpu.core_type<tc>, window_params = [{transform_indices = @transform_0, window_bounds = array<i64: 2>}, {transform_indices = @transform_1, window_bounds = array<i64: 8, 128>}, {transform_indices = @transform_2, window_bounds = array<i64: 8, 128>}, {transform_indices = @transform_3, window_bounds = array<i64: 8, 128>}, {transform_indices = @transform_4, window_bounds = array<i64: 8, 128>}]} {
    %c0 = arith.constant 0 : index
    %0 = memref.load %arg1[%c0] : memref<2xf32, #tpu.memory_space<smem>>
    %c1 = arith.constant 1 : index
    %1 = memref.load %arg1[%c1] : memref<2xf32, #tpu.memory_space<smem>>
    %c0_0 = arith.constant 0 : index
    %c0_1 = arith.constant 0 : index
    %2 = vector.load %arg4[%c0_0, %c0_1] : memref<8x128xf32, #tpu.memory_space<vmem>>, vector<8x128xf32>
    %c0_2 = arith.constant 0 : index
    %c0_3 = arith.constant 0 : index
    %3 = vector.load %arg2[%c0_2, %c0_3] : memref<8x128xf32, #tpu.memory_space<vmem>>, vector<8x128xf32>
    %4 = vector.broadcast %0 : f32 to vector<8x128xf32>
    %5 = arith.mulf %4, %3 : vector<8x128xf32>
    %6 = arith.addf %2, %5 : vector<8x128xf32>
    %c0_4 = arith.constant 0 : index
    %c0_5 = arith.constant 0 : index
    %7 = vector.load %arg3[%c0_4, %c0_5] : memref<8x128xf32, #tpu.memory_space<vmem>>, vector<8x128xf32>
    %8 = vector.broadcast %1 : f32 to vector<8x128xf32>
    %9 = arith.mulf %8, %7 : vector<8x128xf32>
    %10 = arith.addf %6, %9 : vector<8x128xf32>
    %c0_6 = arith.constant 0 : index
    %c0_7 = arith.constant 0 : index
    %11 = vector.load %arg5[%c0_6, %c0_7] : memref<8x128xf32, #tpu.memory_space<vmem>>, vector<8x128xf32>
    tpu.vector_store %arg5[%c0_6, %c0_7], %10 {strides = array<i32>} : memref<8x128xf32, #tpu.memory_space<vmem>>, vector<8x128xf32>,
    return
  }
  func.func @transform_0(%arg0: i32) -> i32 {
    %c0_i32 = arith.constant 0 : i32
    %c0_i32_0 = arith.constant 0 : i32
    return %c0_i32 : i32
  }
  func.func @transform_1(%arg0: i32) -> (i32, i32) {
    %c0_i32 = arith.constant 0 : i32
    %c0_i32_0 = arith.constant 0 : i32
    return %arg0, %c0_i32 : i32, i32
  }
  func.func @transform_2(%arg0: i32) -> (i32, i32) {
    %c0_i32 = arith.constant 0 : i32
    %c0_i32_0 = arith.constant 0 : i32
    return %arg0, %c0_i32 : i32, i32
  }
  func.func @transform_3(%arg0: i32) -> (i32, i32) {
    %c0_i32 = arith.constant 0 : i32
    %c0_i32_0 = arith.constant 0 : i32
    return %arg0, %c0_i32 : i32, i32
  }
  func.func @transform_4(%arg0: i32) -> (i32, i32) {
    %c0_i32 = arith.constant 0 : i32
    %c0_i32_0 = arith.constant 0 : i32
    return %arg0, %c0_i32 : i32, i32
  }
}

</mosaic_0001>

<bundles_post_ra>
// kernel: _step_dicts_impl.1
= control target key start
LH: loop header
LB: loop body
LE: loop exit
PB: predicated region body
PF: predicated region fallthrough
CT: control target
= control target key end

     0   :  { %9 = vsyncpa [#allocation3], 0  ;;  %s104_s0 = inlined_call_operand.vmem [shape: f32[2], index: 0, kind: input, shape index: {}]   ;;  %s105_s1 = inlined_call_operand.vmem [shape: f32[8,128], index: 1, kind: input, shape index: {}]   ;;  %s106_s2 = inlined_call_operand.vmem [shape: f32[8,128], index: 2, kind: input, shape index: {}]   ;;  %s107_s3 = inlined_call_operand.vmem [shape: f32[8,128], index: 3, kind: input, shape index: {}, may-alias: {3,4}]   ;;  %s108_s4 = inlined_call_operand.vmem [shape: f32[8,128], index: 4, kind: output, shape index: {}, may-alias: {3,4}]  }
   0x1   :  { %s16_s17 = sshll.u32 %s104_s0, 4  ;;  %s17_s17 = int_to_ptr.vmem [resolvable:$true] %s16_s17 }
   0x2   :  { %s49_s18 = scalar_lea.vmem %s17_s17, 16  ;;  %p54_p1 = scmp.lt.s32.totalorder %s17_s17, %s17_s17 }
   0x3   :  { %p50_p0 = scmp.ne.s32.totalorder %s17_s17, %s49_s18  ;;  %p55_p2 = scmp.lt.s32.totalorder %s49_s18, %s49_s18 }
   0x5   :  { %p56_p3 = por %p55_p2, %p54_p1 }
   0x7   :  { %p57_p4 = pnand %p56_p3, %p50_p0 }
   0x9   :  { %60 = shalt.err (!%p57_p4)
}
   0xa   :  { %s63_s19 = smov [#allocation2]  }
   0xb   :  { %19 = dma.vmem_to_smem %s17_s17, 16, %s63_s19, [#allocation3]  }
   0xc   :  { %61 = dma.done.wait [#allocation3], 16  }
   0xd   :  { %62 = vsyncadd [#allocation3], 4294967280 }
   0xe   :  { %29 = sfence }
   0xf   :  { %s30_s20 = sld [smem:[#allocation2]]  ;;  %s47_s21 = sld [smem:[#allocation2 + $0x1]]  ;;  %v33_v0 = vld [vmem:[%s105_s1] sm:$0xff] }
  0x10   :  { %v37_v1 = vld [vmem:[%s106_s2] sm:$0xff] }
  0x11   :  { %v32_v2 = vld [vmem:[%s107_s3] sm:$0xff] }
  0x15   :  { %v34_v3 = vstv %s30_s20  ;;  %v38_v4 = vstv %s47_s21 }
  0x16   :  { %v35_v5 = vmul.f32 %v34_v3, %v33_v0  ;;  %v39_v6 = vmul.f32 %v38_v4, %v37_v1 }
  0x18   :  { %v36_v7 = vadd.f32 %v35_v5, %v32_v2 }
  0x1a   :  { %v40_v8 = vadd.f32 %v39_v6, %v36_v7 }
  0x1c   :  { %41 = vst [vmem:[%s108_s4] sm:$0xff] %v40_v8 }
  0x1d   :  { %46 = vsyncpa [#allocation3], 1 }

</bundles_post_ra>
